<compile_context>
chip_gen: v7x
topology: tpu7x:2x2x1
jax: 0.10.0
libtpu: 0.0.40
codegen_flags: <defaults>
</compile_context>

<pallas_src>
import functools

import numpy as np
import jax
import jax.numpy as jnp
from jax import lax
from jax.experimental import pallas as pl
from jax.experimental.pallas import tpu as pltpu


_VMEM_LIMIT = 32 * 1024 * 1024  # safe on v5e/v6e/v7x


# ------------------------------- helpers ------------------------------------

def _round_up(x, m):
    return ((x + m - 1) // m) * m


def _largest_divisor_tile(dim, max_tile, align):
    """dim is a multiple of align; largest multiple of align <= max_tile dividing dim."""
    t = min(dim, (max_tile // align) * align)
    t = max(t, align)
    while t > align and dim % t != 0:
        t -= align
    return t


def _seq_pad(t):
    """Padded sequence length carried through the encoder stream."""
    return _round_up(t, 8) if t <= 512 else _round_up(t, 512)


def _choose_hb(n_head, dh):
    """Heads per attention block: aim for hb*dh ~ 256 lanes, multiple of 128."""
    target = max(1, 256 // max(dh, 1))
    for hb in range(min(n_head, target), 0, -1):
        if n_head % hb == 0 and (hb * dh) % 128 == 0:
            return hb
    return n_head  # full channel dim (always a legal block)


# ----------------------------- Pallas kernels ------------------------------

def _matmul_kernel(x_ref, w_ref, *rest, activation, has_bias, has_residual):
    # Tiled o = act(x @ w + b) (+ residual); f32 accumulator in VMEM scratch.
    nin = int(has_bias) + int(has_residual)
    extra = rest[:nin]
    o_ref, acc_ref = rest[nin], rest[nin + 1]
    b_ref = extra[0] if has_bias else None
    r_ref = (extra[1] if has_bias else extra[0]) if has_residual else None

    @pl.when(pl.program_id(2) == 0)
    def _():
        acc_ref[...] = jnp.zeros_like(acc_ref)

    acc_ref[...] += jnp.dot(x_ref[...], w_ref[...],
                            preferred_element_type=jnp.float32)

    @pl.when(pl.program_id(2) == pl.num_programs(2) - 1)
    def _():
        acc = acc_ref[...]
        if has_bias:
            acc = acc + b_ref[...]
        if activation == "gelu":
            # exact erf GELU (matches torch.nn.GELU / F.gelu default)
            acc = 0.5 * acc * (1.0 + lax.erf(acc * 0.7071067811865476))
        if has_residual:
            acc = acc + r_ref[...].astype(jnp.float32)
        o_ref[...] = acc.astype(o_ref.dtype)


def _layernorm_kernel(x_ref, g_ref, b_ref, o_ref):
    x = x_ref[...].astype(jnp.float32)
    mean = jnp.mean(x, axis=-1, keepdims=True)
    xc = x - mean
    var = jnp.mean(xc * xc, axis=-1, keepdims=True)
    y = xc * lax.rsqrt(var + 1e-5)
    o_ref[...] = (y * g_ref[...] + b_ref[...]).astype(o_ref.dtype)


def _flash_attention_kernel(q_ref, k_ref, v_ref, o_ref, m_ref, l_ref, acc_ref,
                            *, scale, causal, dh, kv_len):
    # Flash attention over one (batch, head-block, q-tile); kv tiles reduce
    # along grid axis 3 with online-softmax stats in VMEM scratch.
    q_idx = pl.program_id(2)
    kv_idx = pl.program_id(3)

    tq = q_ref.shape[1]
    tk = k_ref.shape[1]
    hb = q_ref.shape[2] // dh

    @pl.when(kv_idx == 0)
    def _():
        m_ref[...] = jnp.full(m_ref.shape, -jnp.inf, jnp.float32)
        l_ref[...] = jnp.zeros(l_ref.shape, jnp.float32)
        acc_ref[...] = jnp.zeros(acc_ref.shape, jnp.float32)

    cond = None
    if causal or (kv_len is not None):
        rows = q_idx * tq + lax.broadcasted_iota(jnp.int32, (tq, tk), 0)
        cols = kv_idx * tk + lax.broadcasted_iota(jnp.int32, (tq, tk), 1)
        if causal:
            cond = cols <= rows
        if kv_len is not None:
            kv_ok = cols < kv_len
            cond = kv_ok if cond is None else jnp.logical_and(cond, kv_ok)

    qb = q_ref[0]            # (tq, hb*dh) bf16
    kb = k_ref[0]            # (tk, hb*dh) bf16
    vb = v_ref[0]            # (tk, hb*dh) bf16

    for hh in range(hb):
        sl = slice(hh * dh, (hh + 1) * dh)
        qh = qb[:, sl] * scale                              # bf16
        s = lax.dot_general(qh, kb[:, sl], (((1,), (1,)), ((), ())),
                            preferred_element_type=jnp.float32)   # (tq, tk)
        if cond is not None:
            s = jnp.where(cond, s, -jnp.inf)
        m_prev = m_ref[hh]                                  # (tq, 1)
        m_new = jnp.maximum(m_prev, jnp.max(s, axis=-1, keepdims=True))
        alpha = jnp.exp(m_prev - m_new)
        p = jnp.exp(s - m_new)
        l_ref[hh] = alpha * l_ref[hh] + jnp.sum(p, axis=-1, keepdims=True)
        m_ref[hh] = m_new
        pv = jnp.dot(p.astype(vb.dtype), vb[:, sl],
                     preferred_element_type=jnp.float32)    # (tq, dh)
        acc_ref[hh] = alpha * acc_ref[hh] + pv

    @pl.when(kv_idx == pl.num_programs(3) - 1)
    def _():
        for hh in range(hb):
            inv = pl.reciprocal(l_ref[hh], approx=True)
            o_ref[0, :, hh * dh:(hh + 1) * dh] = (
                acc_ref[hh] * inv).astype(o_ref.dtype)


# ----------------------------- Pallas wrappers ------------------------------

def linear_pallas(x, w, b=None, *, activation=None, residual=None,
                  out_dtype=jnp.bfloat16, tm_max=512, tn_max=768, tk_max=1536):
    """out = act(x @ w + b) (+ residual). x: (..., K) bf16, w: (K, N) bf16."""
    orig = x.shape
    K = orig[-1]
    M = int(np.prod(orig[:-1]))
    N = w.shape[1]

    x2 = x.reshape(M, K).astype(jnp.bfloat16)
    w2 = w.astype(jnp.bfloat16)

    Kp = _round_up(K, 128)
    Np = _round_up(N, 128)
    if M <= 1024:
        tm_ = _round_up(M, 8)        # single M tile: weight streamed once
        Mp = tm_
    else:
        tm_ = tm_max
        Mp = _round_up(M, tm_)
    tk_ = _largest_divisor_tile(Kp, tk_max, 128)
    tn_ = _largest_divisor_tile(Np, tn_max, 128)

    if (Mp, Kp) != (M, K):
        x2 = jnp.pad(x2, ((0, Mp - M), (0, Kp - K)))
    if (Kp, Np) != (K, N):
        w2 = jnp.pad(w2, ((0, Kp - K), (0, Np - N)))

    has_bias = b is not None
    has_residual = residual is not None

    in_specs = [
        pl.BlockSpec((tm_, tk_), lambda i, j, k: (i, k)),
        pl.BlockSpec((tk_, tn_), lambda i, j, k: (k, j)),
    ]
    args = [x2, w2]
    if has_bias:
        b2 = b.astype(jnp.float32).reshape(1, N)
        if Np != N:
            b2 = jnp.pad(b2, ((0, 0), (0, Np - N)))
        in_specs.append(pl.BlockSpec((1, tn_), lambda i, j, k: (0, j)))
        args.append(b2)
    if has_residual:
        r2 = residual.reshape(M, N).astype(jnp.bfloat16)
        if (Mp, Np) != (M, N):
            r2 = jnp.pad(r2, ((0, Mp - M), (0, Np - N)))
        in_specs.append(pl.BlockSpec((tm_, tn_), lambda i, j, k: (i, j)))
        args.append(r2)

    out = pl.pallas_call(
        functools.partial(_matmul_kernel, activation=activation,
                          has_bias=has_bias, has_residual=has_residual),
        grid=(Mp // tm_, Np // tn_, Kp // tk_),
        out_shape=jax.ShapeDtypeStruct((Mp, Np), out_dtype),
        in_specs=in_specs,
        out_specs=pl.BlockSpec((tm_, tn_), lambda i, j, k: (i, j)),
        scratch_shapes=[pltpu.VMEM((tm_, tn_), jnp.float32)],
        compiler_params=pltpu.CompilerParams(
            dimension_semantics=("parallel", "parallel", "arbitrary"),
            vmem_limit_bytes=_VMEM_LIMIT),
    )(*args)

    if (Mp, Np) != (M, N):
        out = out[:M, :N]
    return out.reshape(*orig[:-1], N)


def layernorm_pallas(x, g, b, tm_max=512):
    orig = x.shape
    D = orig[-1]
    M = int(np.prod(orig[:-1]))
    x2 = x.reshape(M, D).astype(jnp.bfloat16)

    Mp = _round_up(M, 8)
    if Mp != M:
        x2 = jnp.pad(x2, ((0, Mp - M), (0, 0)))
    tm_ = _largest_divisor_tile(Mp, tm_max, 8)

    out = pl.pallas_call(
        _layernorm_kernel,
        grid=(Mp // tm_,),
        out_shape=jax.ShapeDtypeStruct((Mp, D), jnp.bfloat16),
        in_specs=[
            pl.BlockSpec((tm_, D), lambda i: (i, 0)),
            pl.BlockSpec((1, D), lambda i: (0, 0)),
            pl.BlockSpec((1, D), lambda i: (0, 0)),
        ],
        out_specs=pl.BlockSpec((tm_, D), lambda i: (i, 0)),
        compiler_params=pltpu.CompilerParams(
            dimension_semantics=("parallel",),
            vmem_limit_bytes=_VMEM_LIMIT),
    )(x2, g.reshape(1, D).astype(jnp.float32), b.reshape(1, D).astype(jnp.float32))
    if Mp != M:
        out = out[:M]
    return out.reshape(orig)


def attention_pallas(q, k, v, n_head, *, causal, kv_len=None):
    """q: (B, Tq, D), k/v: (B, Tk, D) bf16.  Flash attention, no transposes.

    kv_len (static int) masks key positions >= kv_len (padded encoder rows)."""
    B, Tq, D = q.shape
    Tk = k.shape[1]
    dh = D // n_head
    scale = float(dh) ** (-0.5)   # == (dh^-0.25 on q) * (dh^-0.25 on k)
    hb = _choose_hb(n_head, dh)
    hbd = hb * dh

    tq = Tq if Tq <= 512 else 512
    tk = Tk if Tk <= 512 else 512
    Tq_pad = _round_up(Tq, tq)
    Tk_pad = _round_up(Tk, tk)

    qb = q.astype(jnp.bfloat16)
    kb = k.astype(jnp.bfloat16)
    vb = v.astype(jnp.bfloat16)
    if Tq_pad != Tq:
        qb = jnp.pad(qb, ((0, 0), (0, Tq_pad - Tq), (0, 0)))
    if Tk_pad != Tk:
        kb = jnp.pad(kb, ((0, 0), (0, Tk_pad - Tk), (0, 0)))
        vb = jnp.pad(vb, ((0, 0), (0, Tk_pad - Tk), (0, 0)))

    eff_kv = Tk if kv_len is None else int(kv_len)
    kv_mask_len = eff_kv if eff_kv < Tk_pad else None

    out = pl.pallas_call(
        functools.partial(_flash_attention_kernel, scale=scale, causal=causal,
                          dh=dh, kv_len=kv_mask_len),
        grid=(B, n_head // hb, Tq_pad // tq, Tk_pad // tk),
        out_shape=jax.ShapeDtypeStruct((B, Tq_pad, D), jnp.bfloat16),
        in_specs=[
            pl.BlockSpec((1, tq, hbd), lambda b, h, qi, ki: (b, qi, h)),
            pl.BlockSpec((1, tk, hbd), lambda b, h, qi, ki: (b, ki, h)),
            pl.BlockSpec((1, tk, hbd), lambda b, h, qi, ki: (b, ki, h)),
        ],
        out_specs=pl.BlockSpec((1, tq, hbd), lambda b, h, qi, ki: (b, qi, h)),
        scratch_shapes=[
            pltpu.VMEM((hb, tq, 1), jnp.float32),    # running max
            pltpu.VMEM((hb, tq, 1), jnp.float32),    # running denom
            pltpu.VMEM((hb, tq, dh), jnp.float32),   # output accumulator
        ],
        compiler_params=pltpu.CompilerParams(
            dimension_semantics=("parallel", "parallel", "parallel", "arbitrary"),
            vmem_limit_bytes=_VMEM_LIMIT),
    )(qb, kb, vb)

    if Tq_pad != Tq:
        out = out[:, :Tq]
    return out


def conv1d_gelu(x_btc, w_flat, b, stride, out_len_pad=None):
    """Conv1d(kernel=3, padding=1) + GELU via bf16 im2col + tiled Pallas matmul.
    x_btc: (B, L, Cin); w_flat: (3*Cin, Cout) pre-flattened at init; b: (Cout,).
    out_len_pad pads the output time axis (rows feed zeros into the matmul)."""
    # TODO(synk): in-kernel 3-tap accumulation to avoid materializing im2col.
    B, L, Cin = x_btc.shape
    K = 3
    Cout = w_flat.shape[1]
    T = (L + 2 - K) // stride + 1
    xp = jnp.pad(x_btc.astype(jnp.bfloat16), ((0, 0), (1, 1), (0, 0)))
    cols = jnp.concatenate(
        [xp[:, k:k + stride * (T - 1) + 1:stride, :] for k in range(K)], axis=-1)
    if out_len_pad is not None and out_len_pad > T:
        cols = jnp.pad(cols, ((0, 0), (0, out_len_pad - T), (0, 0)))
        T = out_len_pad
    out = linear_pallas(cols.reshape(B * T, K * Cin), w_flat, b, activation="gelu")
    return out.reshape(B, T, Cout)


# ----------------------------- Model components -----------------------------

def sinusoids(length, channels, max_timescale=10000):
    assert channels % 2 == 0
    inc = np.log(max_timescale) / (channels // 2 - 1)
    inv = np.exp(-inc * np.arange(channels // 2))
    scaled = np.arange(length)[:, None] * inv[None, :]
    return jnp.asarray(np.concatenate([np.sin(scaled), np.cos(scaled)], axis=1),
                       dtype=jnp.float32)


def mha_forward(p, x, xa, n_head, *, causal, kv_len, residual):
    src = x if xa is None else xa
    q = linear_pallas(x, p["wq"], p["bq"])
    k = linear_pallas(src, p["wk"], None)          # key projection has no bias
    v = linear_pallas(src, p["wv"], p["bv"])
    wv = attention_pallas(q, k, v, n_head, causal=causal, kv_len=kv_len)
    # output projection with the residual add fused into the matmul epilogue
    return linear_pallas(wv, p["wo"], p["bo"], residual=residual)


def residual_block(p, x, xa, n_head, *, causal, self_kv_len=None, cross_kv_len=None):
    h = layernorm_pallas(x, p["attn_ln_g"], p["attn_ln_b"])
    x = mha_forward(p["attn"], h, None, n_head, causal=causal,
                    kv_len=self_kv_len, residual=x)
    if xa is not None:
        h = layernorm_pallas(x, p["cross_ln_g"], p["cross_ln_b"])
        x = mha_forward(p["cross_attn"], h, xa, n_head, causal=False,
                        kv_len=cross_kv_len, residual=x)
    h = layernorm_pallas(x, p["mlp_ln_g"], p["mlp_ln_b"])
    h = linear_pallas(h, p["mlp_w1"], p["mlp_b1"], activation="gelu")
    x = linear_pallas(h, p["mlp_w2"], p["mlp_b2"], residual=x)
    return x


def encoder_forward(p, mel, dims):
    # mel: (B, n_mels, L) NCL, L = 2 * n_audio_ctx
    n_ctx = dims["n_audio_ctx"]
    enc_pad = p["pos_emb"].shape[0]               # padded, carried through
    x = jnp.transpose(mel, (0, 2, 1)).astype(jnp.bfloat16)   # (B, L, n_mels)
    x = conv1d_gelu(x, p["conv1_w"], p["conv1_b"], stride=1)
    x = conv1d_gelu(x, p["conv2_w"], p["conv2_b"], stride=2, out_len_pad=enc_pad)
    assert x.shape[1] == enc_pad, "incorrect audio shape"
    x = x + p["pos_emb"][None]                    # pos_emb pre-padded, bf16
    kv = n_ctx if n_ctx < enc_pad else None       # mask padded keys
    for blk in p["blocks"]:
        x = residual_block(blk, x, None, dims["n_audio_head"], causal=False,
                           self_kv_len=kv)
    x = layernorm_pallas(x, p["ln_post_g"], p["ln_post_b"])
    return x, n_ctx                               # padded stream + real length


def decoder_forward(p, tokens, xa, xa_len, dims):
    # TODO(synk): kv_cache incremental decoding path not implemented (full-seq forward only).
    T = tokens.shape[-1]
    x = jnp.take(p["token_emb"], tokens, axis=0) + p["pos_emb"][:T][None]
    x = x.astype(jnp.bfloat16)
    for blk in p["blocks"]:
        x = residual_block(blk, x, xa, dims["n_text_head"], causal=True,
                           cross_kv_len=xa_len)
    x = layernorm_pallas(x, p["ln_g"], p["ln_b"])
    # Logits: pre-transposed, vocab-padded embedding, no bias, f32 out.
    logits = linear_pallas(x, p["token_emb_T"], None, out_dtype=jnp.float32)
    return logits[..., :dims["n_vocab"]]


def whisper_forward(params, dims, mel, tokens):
    audio, audio_len = encoder_forward(params["encoder"], mel, dims)
    return decoder_forward(params["decoder"], tokens, audio, audio_len, dims)


# ----------------------------- Parameter init -------------------------------

def init_params(dims, seed=0):
    keys = iter(jax.random.split(jax.random.PRNGKey(seed), 4096))

    def w(shape, scale=0.02):
        return (scale * jax.random.normal(next(keys), shape)).astype(jnp.float32)

    def wb(shape):                      # matmul weights stored bf16 for the MXU
        return w(shape).astype(jnp.bfloat16)

    def zeros(shape):
        return jnp.zeros(shape, jnp.float32)

    def ones(shape):
        return jnp.ones(shape, jnp.float32)

    def conv_w(cout, cin):
        # PyTorch layout (Cout, Cin, K=3) -> pre-flattened (K*Cin, Cout) bf16
        ww = w((cout, cin, 3))
        return jnp.transpose(ww, (2, 1, 0)).reshape(3 * cin, cout).astype(jnp.bfloat16)

    def mha_params(d):
        return dict(wq=wb((d, d)), bq=zeros((d,)), wk=wb((d, d)),
                    wv=wb((d, d)), bv=zeros((d,)), wo=wb((d, d)), bo=zeros((d,)))

    def block_params(d, cross):
        p = dict(attn_ln_g=ones((d,)), attn_ln_b=zeros((d,)),
                 attn=mha_params(d),
                 mlp_ln_g=ones((d,)), mlp_ln_b=zeros((d,)),
                 mlp_w1=wb((d, 4 * d)), mlp_b1=zeros((4 * d,)),
                 mlp_w2=wb((4 * d, d)), mlp_b2=zeros((d,)))
        if cross:
            p["cross_ln_g"] = ones((d,))
            p["cross_ln_b"] = zeros((d,))
            p["cross_attn"] = mha_params(d)
        return p

    Da, Dt = dims["n_audio_state"], dims["n_text_state"]
    enc_ctx = dims["n_audio_ctx"]
    enc_pad = _seq_pad(enc_ctx)
    pos = sinusoids(enc_ctx, Da)
    pos = jnp.pad(pos, ((0, enc_pad - enc_ctx), (0, 0))).astype(jnp.bfloat16)

    enc = dict(
        conv1_w=conv_w(Da, dims["n_mels"]), conv1_b=zeros((Da,)),
        conv2_w=conv_w(Da, Da), conv2_b=zeros((Da,)),
        pos_emb=pos,                    # bf16, pre-padded to _seq_pad(n_audio_ctx)
        blocks=[block_params(Da, False) for _ in range(dims["n_audio_layer"])],
        ln_post_g=ones((Da,)), ln_post_b=zeros((Da,)),
    )
    token_emb = w((dims["n_vocab"], Dt))
    vocab_pad = _round_up(dims["n_vocab"], 128)
    token_emb_T = jnp.pad(
        jnp.transpose(token_emb), ((0, 0), (0, vocab_pad - dims["n_vocab"]))
    ).astype(jnp.bfloat16)
    dec = dict(
        token_emb=token_emb,            # f32, for the embedding gather
        token_emb_T=token_emb_T,        # bf16, pre-transposed + vocab-padded
        pos_emb=w((dims["n_text_ctx"], Dt)),
        blocks=[block_params(Dt, True) for _ in range(dims["n_text_layer"])],
        ln_g=ones((Dt,)), ln_b=zeros((Dt,)),
    )
    return dict(encoder=enc, decoder=dec)


# ----------------------------------- Main ------------------------------------

if __name__ == "__main__":
    dims = dict(
        n_mels=8, n_audio_ctx=16, n_audio_state=32, n_audio_head=4, n_audio_layer=2,
        n_vocab=64, n_text_ctx=8, n_text_state=32, n_text_head=4, n_text_layer=2,
    )
    params = init_params(dims, seed=0)

    key = jax.random.PRNGKey(0)
    k_mel, k_tok = jax.random.split(key)
    # mel: (batch, n_mels, 2 * n_audio_ctx) NCL, tokens: (batch, n_text_ctx) int32
    mel = jax.random.normal(k_mel, (2, dims["n_mels"], 2 * dims["n_audio_ctx"]),
                            dtype=jnp.float32)
    tokens = jax.random.randint(k_tok, (2, dims["n_text_ctx"]), 0, dims["n_vocab"],
                                dtype=jnp.int32)

    logits = whisper_forward(params, dims, mel, tokens)
    jax.block_until_ready(logits)
    assert logits.shape == (2, dims["n_text_ctx"], dims["n_vocab"])
    assert logits.dtype == jnp.float32
    assert bool(jnp.all(jnp.isfinite(logits)))
    print("KERNEL_OK")
</pallas_src>

<mosaic_0001>
module attributes {stable_mosaic.version = 11 : i64} {
  func.func @_matmul_kernel(%arg0: i32, %arg1: i32, %arg2: i32, %arg3: memref<64x128xbf16, #tpu.memory_space<vmem>>, %arg4: memref<128x128xbf16, #tpu.memory_space<vmem>>, %arg5: memref<1x128xf32, #tpu.memory_space<vmem>>, %arg6: memref<64x128xbf16, #tpu.memory_space<vmem>>, %arg7: memref<64x128xf32, #tpu.memory_space<vmem>>) attributes {dimension_semantics = [#tpu.dimension_semantics<parallel>, #tpu.dimension_semantics<parallel>, #tpu.dimension_semantics<arbitrary>], iteration_bounds = array<i64: 1, 1, 1>, scalar_prefetch = 0 : i64, scratch_operands = 1 : i64, tpu.core_type = #tpu.core_type<tc>, window_params = [{transform_indices = @transform_0, window_bounds = array<i64: 64, 128>}, {transform_indices = @transform_1, window_bounds = array<i64: 128, 128>}, {transform_indices = @transform_2, window_bounds = array<i64: 1, 128>}, {transform_indices = @transform_3, window_bounds = array<i64: 64, 128>}]} {
    %c0_i32 = arith.constant 0 : i32
    %0 = arith.cmpi eq, %arg2, %c0_i32 : i32
    %1 = arith.extui %0 : i1 to i32
    %c0_i32_0 = arith.constant 0 : i32
    %2 = arith.cmpi ne, %1, %c0_i32_0 : i32
    scf.if %2 {
      %cst_10 = arith.constant 0.000000e+00 : f32
      %12 = vector.broadcast %cst_10 : f32 to vector<64x128xf32>
      %c0_11 = arith.constant 0 : index
      %c0_12 = arith.constant 0 : index
      %13 = vector.load %arg7[%c0_11, %c0_12] : memref<64x128xf32, #tpu.memory_space<vmem>>, vector<64x128xf32>
      tpu.vector_store %arg7[%c0_11, %c0_12], %12 {strides = array<i32>} : memref<64x128xf32, #tpu.memory_space<vmem>>, vector<64x128xf32>,
    } else {
    }
    %c0 = arith.constant 0 : index
    %c0_1 = arith.constant 0 : index
    %3 = vector.load %arg7[%c0, %c0_1] : memref<64x128xf32, #tpu.memory_space<vmem>>, vector<64x128xf32>
    %c0_2 = arith.constant 0 : index
    %c0_3 = arith.constant 0 : index
    %4 = vector.load %arg3[%c0_2, %c0_3] : memref<64x128xbf16, #tpu.memory_space<vmem>>, vector<64x128xbf16>
    %c0_4 = arith.constant 0 : index
    %c0_5 = arith.constant 0 : index
    %5 = vector.load %arg4[%c0_4, %c0_5] : memref<128x128xbf16, #tpu.memory_space<vmem>>, vector<128x128xbf16>
    %cst = arith.constant dense<0.000000e+00> : vector<64x128xf32>
    %6 = tpu.matmul %4, %5, %cst {dimension_numbers = #tpu.dot_dimension_numbers<[1], [0], [0], [1], [0, 0, 1, 1], [], []>} : vector<64x128xbf16>, vector<128x128xbf16>, vector<64x128xf32> -> vector<64x128xf32>
    %7 = arith.addf %3, %6 : vector<64x128xf32>
    %c0_6 = arith.constant 0 : index
    %c0_7 = arith.constant 0 : index
    %8 = vector.load %arg7[%c0_6, %c0_7] : memref<64x128xf32, #tpu.memory_space<vmem>>, vector<64x128xf32>
    tpu.vector_store %arg7[%c0_6, %c0_7], %7 {strides = array<i32>} : memref<64x128xf32, #tpu.memory_space<vmem>>, vector<64x128xf32>,
    %c0_i32_8 = arith.constant 0 : i32
    %9 = arith.cmpi eq, %arg2, %c0_i32_8 : i32
    %10 = arith.extui %9 : i1 to i32
    %c0_i32_9 = arith.constant 0 : i32
    %11 = arith.cmpi ne, %10, %c0_i32_9 : i32
    scf.if %11 {
      %c0_10 = arith.constant 0 : index
      %c0_11 = arith.constant 0 : index
      %12 = vector.load %arg7[%c0_10, %c0_11] : memref<64x128xf32, #tpu.memory_space<vmem>>, vector<64x128xf32>
      %c0_12 = arith.constant 0 : index
      %c0_13 = arith.constant 0 : index
      %13 = vector.load %arg5[%c0_12, %c0_13] : memref<1x128xf32, #tpu.memory_space<vmem>>, vector<1x128xf32>
      %14 = vector.broadcast %13 : vector<1x128xf32> to vector<64x128xf32>
      %15 = arith.addf %12, %14 : vector<64x128xf32>
      %cst_14 = arith.constant 5.000000e-01 : f32
      %16 = vector.broadcast %cst_14 : f32 to vector<64x128xf32>
      %17 = arith.mulf %16, %15 : vector<64x128xf32>
      %cst_15 = arith.constant 0.707106769 : f32
      %18 = vector.broadcast %cst_15 : f32 to vector<64x128xf32>
      %19 = arith.mulf %15, %18 : vector<64x128xf32>
      %20 = math.erf %19 : vector<64x128xf32>
      %cst_16 = arith.constant 1.000000e+00 : f32
      %21 = vector.broadcast %cst_16 : f32 to vector<64x128xf32>
      %22 = arith.addf %21, %20 : vector<64x128xf32>
      %23 = arith.mulf %17, %22 : vector<64x128xf32>
      %24 = arith.truncf %23 : vector<64x128xf32> to vector<64x128xbf16>
      %c0_17 = arith.constant 0 : index
      %c0_18 = arith.constant 0 : index
      %25 = vector.load %arg6[%c0_17, %c0_18] : memref<64x128xbf16, #tpu.memory_space<vmem>>, vector<64x128xbf16>
      tpu.vector_store %arg6[%c0_17, %c0_18], %24 {strides = array<i32>} : memref<64x128xbf16, #tpu.memory_space<vmem>>, vector<64x128xbf16>,
    } else {
    }
    return
  }
  func.func @transform_0(%arg0: i32, %arg1: i32, %arg2: i32) -> (i32, i32) {
    %c0_i32 = arith.constant 0 : i32
    return %arg0, %arg2 : i32, i32
  }
  func.func @transform_1(%arg0: i32, %arg1: i32, %arg2: i32) -> (i32, i32) {
    %c0_i32 = arith.constant 0 : i32
    return %arg2, %arg1 : i32, i32
  }
  func.func @transform_2(%arg0: i32, %arg1: i32, %arg2: i32) -> (i32, i32) {
    %c0_i32 = arith.constant 0 : i32
    %c0_i32_0 = arith.constant 0 : i32
    return %c0_i32, %arg1 : i32, i32
  }
  func.func @transform_3(%arg0: i32, %arg1: i32, %arg2: i32) -> (i32, i32) {
    %c0_i32 = arith.constant 0 : i32
    return %arg0, %arg1 : i32, i32
  }
}

</mosaic_0001>

<bundles_post_ra>
// kernel: tpu_custom_call.1
= control target key start
LH: loop header
LB: loop body
LE: loop exit
PB: predicated region body
PF: predicated region fallthrough
CT: control target
= control target key end

     0   :  { %8 = vsyncpa [#allocation4], 0  ;;  %s647_s0 = inlined_call_operand.hbm [shape: bf16[64,128], index: 0, kind: input, shape index: {}]   ;;  %s648_s1 = inlined_call_operand.hbm [shape: bf16[128,128], index: 1, kind: input, shape index: {}]   ;;  %s649_s2 = inlined_call_operand.vmem [shape: f32[1,128], index: 2, kind: input, shape index: {}]   ;;  %s650_s3 = inlined_call_operand.hbm [shape: bf16[64,128], index: 3, kind: output, shape index: {}]  }
   0x1   :  { %9 = vsyncpa [#allocation7], 0 }
   0x2   :  { %10 = vsyncpa [#allocation5], 0  ;;  %s574_s12 = smov [#allocation3]   ;;  %s502_s16 = scalar_lea.hbm %s647_s0, 512 }
   0x3   :  { %s16_s13 = sshll.u32 %s574_s12, 4  ;;  %p503_p0 = scmp.ne.s32.totalorder %s647_s0, %s502_s16  ;;  %s17_s13 = int_to_ptr.vmem [resolvable:$true] %s16_s13 }
   0x4   :  { %p506_p1 = scmp.lt.u32.totalorder %s502_s16, %s647_s0 }
   0x6   :  { %p508_p2 = pnand %p506_p1, %p503_p0 }
   0x8   :  { %511 = shalt.err (!%p508_p2)
}
   0x9   :  { %s512_s21 = scalar_lea.vmem %s17_s13, 512  ;;  %p517_p4 = scmp.lt.s32.totalorder %s17_s13, %s17_s13 }
   0xa   :  { %p513_p3 = scmp.ne.s32.totalorder %s17_s13, %s512_s21  ;;  %p518_p5 = scmp.lt.s32.totalorder %s512_s21, %s512_s21 }
   0xc   :  { %p519_p6 = por %p518_p5, %p517_p4 }
   0xe   :  { %p520_p7 = pnand %p519_p6, %p513_p3 }
  0x10   :  { %523 = shalt.err (!%p520_p7)
}
  0x11   :  { %s575_s22 = smov 64   ;;  %s576_s23 = smov 4  }
  0x12   :  { %22 = dma.hbm_to_vmem [thread:$0]  %s647_s0, 512, %s17_s13, [#allocation4], %s575_s22, %s575_s22, %s576_s23  }
  0x13   :  { %s577_s26 = smov [#allocation6]   ;;  %s524_s30 = scalar_lea.hbm %s648_s1, 1024 }
  0x14   :  { %s28_s27 = sshll.u32 %s577_s26, 4  ;;  %p525_p8 = scmp.ne.s32.totalorder %s648_s1, %s524_s30  ;;  %s29_s27 = int_to_ptr.vmem [resolvable:$true] %s28_s27 }
  0x15   :  { %p528_p9 = scmp.lt.u32.totalorder %s524_s30, %s648_s1 }
  0x17   :  { %p530_p10 = pnand %p528_p9, %p525_p8 }
  0x19   :  { %533 = shalt.err (!%p530_p10)
}
  0x1a   :  { %s534_s8 = scalar_lea.vmem %s29_s27, 1024  ;;  %p539_p12 = scmp.lt.s32.totalorder %s29_s27, %s29_s27 }
  0x1b   :  { %p535_p11 = scmp.ne.s32.totalorder %s29_s27, %s534_s8  ;;  %p540_p13 = scmp.lt.s32.totalorder %s534_s8, %s534_s8 }
  0x1d   :  { %p541_p0 = por %p540_p13, %p539_p12 }
  0x1f   :  { %p542_p1 = pnand %p541_p0, %p535_p11 }
  0x21   :  { %545 = shalt.err (!%p542_p1)
}
  0x22   :  { %34 = dma.hbm_to_vmem [thread:$0]  %s648_s1, 1024, %s29_s27, [#allocation7], %s575_s22, %s575_s22, %s576_s23  }
  0x23   :  { %568 = dma.done.wait [#allocation4], 512  }
  0x24   :  { %569 = vsyncadd [#allocation4], 4294966784 }
  0x25   :  { %570 = dma.done.wait [#allocation7], 1024  }
  0x26   :  { %571 = vsyncadd [#allocation7], 4294966272  ;;  %v474_v0 = vld [vmem:[#allocation6] sm:$0xff]   ;;  %v475_v1 = vld [vmem:[#allocation6 + $0x8] sm:$0xff]  }
  0x27   :  { %429 = vmatprep.subr.bf16.mxu0 %v474_v0  ;;  %453 = vmatprep.subr.bf16.mxu1 %v474_v0  ;;  %v476_v2 = vld [vmem:[#allocation6 + $0x10] sm:$0xff]   ;;  %v477_v3 = vld [vmem:[#allocation6 + $0x18] sm:$0xff]   ;;  %v482_v4 = vld [vmem:[#allocation3] sm:$0xff]  }
  0x28   :  { %430 = vmatpush3.bf16.msra.mxu0 %v474_v0  ;;  %461 = vmatpush3.bf16.msra.mxu1 %v474_v0  ;;  %v483_v5 = vld [vmem:[#allocation3 + $0x10] sm:$0xff]   ;;  %v478_v6 = vld [vmem:[#allocation6 + $0x20] sm:$0xff]   ;;  %v479_v7 = vld [vmem:[#allocation6 + $0x28] sm:$0xff]  }
  0x29   :  { %431 = vmatprep.subr.bf16.mxu0 %v475_v1  ;;  %454 = vmatprep.subr.bf16.mxu1 %v475_v1  ;;  %v480_v8 = vld [vmem:[#allocation6 + $0x30] sm:$0xff]   ;;  %v481_v9 = vld [vmem:[#allocation6 + $0x38] sm:$0xff]   ;;  %v484_v10 = vld [vmem:[#allocation3 + $0x8] sm:$0xff]  }
  0x2a   :  { %445 = vmatprep.mubr.bf16.mxu0 %v482_v4  ;;  %449 = vmatprep.mubr.bf16.mxu1 %v483_v5  ;;  %v485_v11 = vld [vmem:[#allocation3 + $0x18] sm:$0xff]   ;;  %v377_v12 = vld [vmem:[%s649_s2] ss:$0 sm:$0xff]  ;;  %s578_s2 = smov [#allocation8]  }
  0x2b   :  { %s352_s11 = sshll.u32 %s578_s2, 4  ;;  %s353_s11 = int_to_ptr.vmem [resolvable:$true] %s352_s11 }
  0x2c   :  { %432 = vmatpush3.bf16.msra.mxu0 %v475_v1  ;;  %462 = vmatpush3.bf16.msra.mxu1 %v475_v1  ;;  %s546_s12 = scalar_lea.vmem %s353_s11, 512  ;;  %p551_p3 = scmp.lt.s32.totalorder %s353_s11, %s353_s11 }
  0x2d   :  { %433 = vmatprep.subr.bf16.mxu0 %v476_v2  ;;  %455 = vmatprep.subr.bf16.mxu1 %v476_v2  ;;  %p547_p2 = scmp.ne.s32.totalorder %s353_s11, %s546_s12  ;;  %p552_p4 = scmp.lt.s32.totalorder %s546_s12, %s546_s12 }
  0x2f   :  { %p553_p5 = por %p552_p4, %p551_p3 }
  0x30   :  { %434 = vmatpush3.bf16.msra.mxu0 %v476_v2  ;;  %463 = vmatpush3.bf16.msra.mxu1 %v476_v2 }
  0x31   :  { %435 = vmatprep.subr.bf16.mxu0 %v477_v3  ;;  %456 = vmatprep.subr.bf16.mxu1 %v477_v3  ;;  %p554_p6 = pnand %p553_p5, %p547_p2 }
  0x34   :  { %436 = vmatpush3.bf16.msra.mxu0 %v477_v3  ;;  %464 = vmatpush3.bf16.msra.mxu1 %v477_v3 }
  0x35   :  { %437 = vmatprep.subr.bf16.mxu0 %v478_v6  ;;  %457 = vmatprep.subr.bf16.mxu1 %v478_v6 }
  0x38   :  { %438 = vmatpush3.bf16.msra.mxu0 %v478_v6  ;;  %465 = vmatpush3.bf16.msra.mxu1 %v478_v6 }
  0x39   :  { %439 = vmatprep.subr.bf16.mxu0 %v479_v7  ;;  %458 = vmatprep.subr.bf16.mxu1 %v479_v7 }
  0x3c   :  { %440 = vmatpush3.bf16.msra.mxu0 %v479_v7  ;;  %466 = vmatpush3.bf16.msra.mxu1 %v479_v7 }
  0x3d   :  { %441 = vmatprep.subr.bf16.mxu0 %v480_v8  ;;  %459 = vmatprep.subr.bf16.mxu1 %v480_v8 }
  0x40   :  { %442 = vmatpush3.bf16.msra.mxu0 %v480_v8  ;;  %467 = vmatpush3.bf16.msra.mxu1 %v480_v8 }
  0x41   :  { %443 = vmatprep.subr.bf16.mxu0 %v481_v9  ;;  %460 = vmatprep.subr.bf16.mxu1 %v481_v9 }
  0x44   :  { %444 = vmatpush3.bf16.msra.mxu0 %v481_v9  ;;  %468 = vmatpush3.bf16.msra.mxu1 %v481_v9 }
  0x47   :  { %446 = vmatmul.mubr.bf16.vlgmr.msra.gmra.mrb[0].mxu0 %v484_v10  ;;  %450 = vmatmul.mubr.bf16.vlgmr.msra.gmra.mrb[0].mxu1 %v485_v11 }
 0x11a   :  { %v447_v13 = vpop.f32.mrb[0].mxu0  ;;  %v451_v14 = vpop.f32.mrb[0].mxu1 }
 0x11b   :  { %v261_v15 = vadd.f32 %v447_v13, %v377_v12  ;;  %v265_v16 = vadd.f32 %v451_v14, %v377_v12  ;;  %v194_v17 = vpop.f32.mrb[1].mxu0  ;;  %v210_v18 = vpop.f32.mrb[1].mxu1 }
 0x11c   :  { %v259_v19 = vadd.f32 %v377_v12, %v194_v17  ;;  %v263_v20 = vadd.f32 %v377_v12, %v210_v18  ;;  %v448_v21 = vpop.f32.mrb[2].mxu0  ;;  %v452_v22 = vpop.f32.mrb[2].mxu1 }
 0x11d   :  { %v277_v23 = vmul.f32 0.70710677, %v261_v15  ;;  %v281_v24 = vmul.f32 0.70710677, %v265_v16  ;;  %v262_v27 = vadd.f32 %v448_v21, %v377_v12  ;;  %v266_v28 = vadd.f32 %v452_v22, %v377_v12  ;;  %v197_v29 = vpop.f32.mrb[3].mxu0  ;;  %v213_v30 = vpop.f32.mrb[3].mxu1 }
 0x11e   :  { %v275_v25 = vmul.f32 0.70710677, %v259_v19  ;;  %v279_v26 = vmul.f32 0.70710677, %v263_v20  ;;  %v260_v31 = vadd.f32 %v377_v12, %v197_v29  ;;  %v264_v32 = vadd.f32 %v377_v12, %v213_v30 }
 0x11f   :  { %486 = verf.f32 %v277_v23  ;;  %v278_v33 = vmul.f32 0.70710677, %v262_v27  ;;  %v282_v34 = vmul.f32 0.70710677, %v266_v28  ;;  %v269_v43 = vmul.f32 0.5, %v261_v15 }
 0x120   :  { %488 = verf.f32 %v281_v24  ;;  %v276_v35 = vmul.f32 0.70710677, %v260_v31  ;;  %v280_v36 = vmul.f32 0.70710677, %v264_v32  ;;  %v273_v44 = vmul.f32 0.5, %v265_v16 }
 0x121   :  { %490 = verf.f32 %v275_v25  ;;  %v267_v47 = vmul.f32 0.5, %v259_v19  ;;  %v270_v49 = vmul.f32 0.5, %v262_v27  ;;  %v271_v52 = vmul.f32 0.5, %v263_v20 }
 0x122   :  { %492 = verf.f32 %v279_v26  ;;  %v274_v54 = vmul.f32 0.5, %v266_v28  ;;  %v268_v59 = vmul.f32 0.5, %v260_v31  ;;  %v272_v63 = vmul.f32 0.5, %v264_v32 }
 0x123   :  { %494 = verf.f32 %v278_v33 }
 0x124   :  { %496 = verf.f32 %v282_v34 }
 0x125   :  { %498 = verf.f32 %v276_v35 }
 0x126   :  { %500 = verf.f32 %v280_v36 }
 0x129   :  { %v487_v37 = vpop.eup %486 }
 0x12a   :  { %v489_v38 = vpop.eup %488  ;;  %v293_v41 = vadd.f32 1.0, %v487_v37 }
 0x12b   :  { %v491_v39 = vpop.eup %490  ;;  %v297_v45 = vadd.f32 1.0, %v489_v38 }
 0x12c   :  { %v493_v40 = vpop.eup %492  ;;  %v291_v48 = vadd.f32 1.0, %v491_v39  ;;  %v301_v57 = vmul.f32 %v293_v41, %v269_v43 }
 0x12d   :  { %v495_v42 = vpop.eup %494  ;;  %v295_v53 = vadd.f32 1.0, %v493_v40  ;;  %v305_v61 = vmul.f32 %v297_v45, %v273_v44 }
 0x12e   :  { %v497_v46 = vpop.eup %496  ;;  %v294_v50 = vadd.f32 1.0, %v495_v42  ;;  %v299_v1 = vmul.f32 %v291_v48, %v267_v47 }
 0x12f   :  { %v499_v51 = vpop.eup %498  ;;  %v298_v55 = vadd.f32 1.0, %v497_v46  ;;  %v303_v4 = vmul.f32 %v295_v53, %v271_v52 }
 0x130   :  { %v501_v56 = vpop.eup %500  ;;  %v302_v58 = vmul.f32 %v294_v50, %v270_v49  ;;  %v292_v60 = vadd.f32 1.0, %v499_v51 }
 0x131   :  { %v306_v62 = vmul.f32 %v298_v55, %v274_v54  ;;  %v296_v0 = vadd.f32 1.0, %v501_v56 }
 0x132   :  { %v402_v2 = vpack.c.bf16 %v302_v58, %v301_v57  ;;  %v300_v3 = vmul.f32 %v292_v60, %v268_v59 }
 0x133   :  { %v412_v5 = vpack.c.bf16 %v306_v62, %v305_v61  ;;  %v304_v6 = vmul.f32 %v296_v0, %v272_v63 }
 0x134   :  { %414 = vst [vmem:[#allocation8 + $0x8] sm:$0xff] %v402_v2   ;;  %v397_v7 = vpack.c.bf16 %v300_v3, %v299_v1 }
 0x135   :  { %416 = vst [vmem:[#allocation8 + $0x18] sm:$0xff] %v412_v5   ;;  %v407_v8 = vpack.c.bf16 %v304_v6, %v303_v4 }
 0x136   :  { %398 = vst [vmem:[#allocation8] sm:$0xff] %v397_v7  }
 0x137   :  { %415 = vst [vmem:[#allocation8 + $0x10] sm:$0xff] %v407_v8  }
 0x138   :  { %557 = shalt.err (!%p554_p6)
}
 0x139   :  { %s558_s15 = scalar_lea.hbm %s650_s3, 512 }
 0x13a   :  { %p559_p7 = scmp.ne.s32.totalorder %s650_s3, %s558_s15  ;;  %p562_p8 = scmp.lt.u32.totalorder %s558_s15, %s650_s3 }
 0x13c   :  { %p564_p9 = pnand %p562_p8, %p559_p7 }
 0x13e   :  { %567 = shalt.err (!%p564_p9)
}
 0x13f   :  { %358 = dma.vmem_to_hbm [thread:$0]  %s353_s11, 512, %s650_s3, [#allocation5], %s575_s22, %s575_s22, %s576_s23  }
 0x140   :  { %572 = dma.done.wait [#allocation5], 512  }
 0x141   :  { %573 = vsyncadd [#allocation5], 4294966784 }
 0x142   :  { %362 = vsyncpa [#allocation4], 1 }
 0x143   :  { %363 = vsyncpa [#allocation7], 1 }
 0x144   :  { %364 = vsyncpa [#allocation5], 1 }

</bundles_post_ra>
